<compile_context>
chip_gen: v7x
topology: tpu7x:2x2x1
jax: 0.10.0
libtpu: 0.0.40
codegen_flags: <defaults>
</compile_context>

<pallas_src>
import math
from functools import partial

import jax
import jax.numpy as jnp
from jax.experimental import pallas as pl
from jax.experimental.pallas import tpu as pltpu


# ---------------------------------------------------------------------------
# Helpers: tile picking (respect the (8,128) block rule; full dim is always
# legal), head grouping (lane-dense column slabs), VMEM budget.
# ---------------------------------------------------------------------------
def _pick_tile(dim, preferred, align):
    if dim <= preferred:
        return dim
    t = (preferred // align) * align
    while t >= align:
        if dim % t == 0:
            return t
        t -= align
    return dim  # no aligned divisor: full dim (legal, just unpipelined)


def _pick_head_group(h, d_k, max_cols=512):
    """Smallest head-group whose column slab is a multiple of 128 lanes
    (lane-dense loads/stores); falls back to all heads (full-D slab)."""
    for hg in range(1, h + 1):
        if h % hg == 0 and (hg * d_k) % 128 == 0 and hg * d_k <= max_cols:
            return hg
    return h


def _vmem_limit(nbytes):
    """Explicit scoped-VMEM limit only when the default would be too small
    (16 MiB on v5e / 32 MiB on v6e,v7x); capped below v7x's 64 MiB."""
    need = int(nbytes * 1.5) + (2 << 20)
    if need <= (16 << 20):
        return None
    return min(need, 60 << 20)


# ---------------------------------------------------------------------------
# Kernel 1: fused Q/K/V projection.  grid = (B, S//tm).
# Weights (3, D, D) bf16 + biases stay VMEM-resident (constant index_map).
# Outputs are lane-dense (B, S, D) bf16 slabs (head split happens in kernel 2
# via column BlockSpecs, not via masked per-head stores here).
# ---------------------------------------------------------------------------
def qkv_proj_kernel(xq_ref, xk_ref, xv_ref, w_ref, b_ref, q_ref, k_ref, v_ref):
    for p, (x_ref, o_ref) in enumerate(
            zip((xq_ref, xk_ref, xv_ref), (q_ref, k_ref, v_ref))):
        x = x_ref[0].astype(jnp.bfloat16)                       # (tm, D)
        y = jnp.dot(x, w_ref[p], preferred_element_type=jnp.float32)
        o_ref[0] = (y + b_ref[p]).astype(o_ref.dtype)           # lane-dense (tm, D)


def fused_qkv_projection(query, key, value, w_qkv, b_qkv):
    B, S, D = query.shape
    tm = _pick_tile(S, 512, 16)
    out_sds = jax.ShapeDtypeStruct((B, S, D), jnp.bfloat16)
    x_spec = pl.BlockSpec((1, tm, D), lambda b, si: (b, si, 0))
    o_spec = pl.BlockSpec((1, tm, D), lambda b, si: (b, si, 0))
    w_spec = pl.BlockSpec((3, D, D), lambda b, si: (0, 0, 0))   # resident
    b_spec = pl.BlockSpec((3, 1, D), lambda b, si: (0, 0, 0))   # resident
    vmem = _vmem_limit(
        3 * 2 * tm * D * 4          # double-buffered f32 inputs
        + 2 * 3 * D * D * 2         # resident bf16 weights (2 bufs allocated)
        + 3 * 2 * tm * D * 2        # double-buffered bf16 outputs
        + 2 * 3 * D * 4)            # biases
    return pl.pallas_call(
        qkv_proj_kernel,
        out_shape=(out_sds, out_sds, out_sds),
        grid=(B, S // tm),
        in_specs=[x_spec, x_spec, x_spec, w_spec, b_spec],
        out_specs=(o_spec, o_spec, o_spec),
        compiler_params=pltpu.CompilerParams(
            dimension_semantics=("parallel", "parallel"),
            vmem_limit_bytes=vmem),
    )(query, key, value, w_qkv, b_qkv)


# ---------------------------------------------------------------------------
# Kernel 2: attention.  grid = (B, head_groups, S//tq), query axis innermost.
# K/V for one (batch, head-group) have a qi-independent index_map, so they are
# DMA'd once and stay VMEM-resident across all query tiles.  Softmax is exact
# (full resident K), per-head inside the group; the merged output is written
# as one lane-dense (tq, hg*d_k) store into (B, S, D) layout.
# 1/sqrt(d_k) is already folded into w_q, so no score scaling here.
# ---------------------------------------------------------------------------
def attn_kernel(q_ref, k_ref, v_ref, o_ref, *, hg, d_k):
    q = q_ref[0]                       # (tq, hg*d_k) bf16, pre-scaled
    k = k_ref[0]                       # (S,  hg*d_k) bf16, resident
    v = v_ref[0]                       # (S,  hg*d_k) bf16, resident
    outs = []
    for j in range(hg):                # per-head softmax within the group
        c0, c1 = j * d_k, (j + 1) * d_k
        s = jax.lax.dot_general(q[:, c0:c1], k[:, c0:c1],
                                (((1,), (1,)), ((), ())),
                                preferred_element_type=jnp.float32)   # (tq, S)
        m = s.max(axis=-1, keepdims=True)
        p = jnp.exp(s - m)
        l = p.sum(axis=-1, keepdims=True)
        o = jnp.dot(p.astype(v.dtype), v[:, c0:c1],
                    preferred_element_type=jnp.float32)               # (tq, d_k)
        outs.append(o * pl.reciprocal(l, approx=True))
    o_ref[0] = jnp.concatenate(outs, axis=-1).astype(o_ref.dtype)


def attention(q, k, v, h):
    B, S, D = q.shape
    d_k = D // h
    hg = _pick_head_group(h, d_k)      # heads per grid step (lane-dense slab)
    G = h // hg
    cols = hg * d_k
    tq = _pick_tile(S, 512, 16)
    q_spec = pl.BlockSpec((1, tq, cols), lambda b, g, qi: (b, qi, g))
    kv_spec = pl.BlockSpec((1, S, cols), lambda b, g, qi: (b, 0, g))  # resident across qi
    o_spec = pl.BlockSpec((1, tq, cols), lambda b, g, qi: (b, qi, g))
    vmem = _vmem_limit(
        2 * tq * cols * 2              # q tiles (double-buffered, bf16)
        + 2 * 2 * S * cols * 2         # resident K and V (2 bufs allocated each)
        + 2 * tq * cols * 2            # output tiles (double-buffered, bf16)
        + tq * S * 4)                  # f32 score tile
    return pl.pallas_call(
        partial(attn_kernel, hg=hg, d_k=d_k),
        out_shape=jax.ShapeDtypeStruct((B, S, D), jnp.bfloat16),
        grid=(B, G, S // tq),
        in_specs=[q_spec, kv_spec, kv_spec],
        out_specs=o_spec,
        compiler_params=pltpu.CompilerParams(
            dimension_semantics=("parallel", "parallel", "arbitrary"),
            vmem_limit_bytes=vmem),
    )(q, k, v)


# ---------------------------------------------------------------------------
# Kernel 3: output projection.  grid = (B, S//tm).
# Consumes the merged (B, S, D) bf16 attention output directly; the (D, D)
# weight is VMEM-resident; single (tm, D) x (D, D) matmul (K = D).
# ---------------------------------------------------------------------------
def out_proj_kernel(x_ref, w_ref, b_ref, o_ref):
    x = x_ref[0]                                               # (tm, D) bf16
    y = jnp.dot(x, w_ref[...], preferred_element_type=jnp.float32)
    o_ref[0] = (y + b_ref[...]).astype(o_ref.dtype)


def output_projection(x, w_o, b_o):
    B, S, D = x.shape
    tm = _pick_tile(S, 512, 16)
    vmem = _vmem_limit(
        2 * tm * D * 2 + 2 * D * D * 2 + 2 * tm * D * 4 + 2 * D * 4)
    return pl.pallas_call(
        out_proj_kernel,
        out_shape=jax.ShapeDtypeStruct((B, S, D), jnp.float32),
        grid=(B, S // tm),
        in_specs=[pl.BlockSpec((1, tm, D), lambda b, si: (b, si, 0)),
                  pl.BlockSpec((D, D), lambda b, si: (0, 0)),   # resident
                  pl.BlockSpec((1, D), lambda b, si: (0, 0))],  # resident
        out_specs=pl.BlockSpec((1, tm, D), lambda b, si: (b, si, 0)),
        compiler_params=pltpu.CompilerParams(
            dimension_semantics=("parallel", "parallel"),
            vmem_limit_bytes=vmem),
    )(x, w_o, b_o)


# ---------------------------------------------------------------------------
# MultiHeadedAttention forward.  Dropout is declared in the module's __init__
# but never applied in forward, so it is omitted here too.
# TODO(synk): self.attn (the full SxS p_attn) is a stored side effect only; it
# is never materialized here and is not part of the return.
# ---------------------------------------------------------------------------
def multi_headed_attention(prepped, query, key, value, h):
    q, k, v = fused_qkv_projection(query, key, value,
                                   prepped["w_qkv"], prepped["b_qkv"])
    x = attention(q, k, v, h)                      # (B, S, D) bf16, merged heads
    return output_projection(x, prepped["w_o"], prepped["b_o"])


def prepare_params(params, h):
    """One-time weight prep: torch [out,in] -> [in,out], bf16 matmul operands,
    1/sqrt(d_k) folded into the Q projection (free at prep time)."""
    D = params["w_q"].shape[0]
    scale = 1.0 / math.sqrt(D // h)
    w_qkv = jnp.stack([params["w_q"].T * scale,
                       params["w_k"].T,
                       params["w_v"].T]).astype(jnp.bfloat16)            # (3, D, D)
    b_qkv = jnp.stack([params["b_q"] * scale,
                       params["b_k"],
                       params["b_v"]]).reshape(3, 1, D).astype(jnp.float32)
    w_o = params["w_o"].T.astype(jnp.bfloat16)                           # (D, D)
    b_o = params["b_o"].reshape(1, D).astype(jnp.float32)                # (1, D)
    return {"w_qkv": w_qkv, "b_qkv": b_qkv, "w_o": w_o, "b_o": b_o}


# ---------------------------------------------------------------------------
# Deterministic parameter init (xavier_uniform weights, as in the module).
# ---------------------------------------------------------------------------
def xavier_uniform(rng, shape):
    fan_out, fan_in = shape
    bound = math.sqrt(6.0 / (fan_in + fan_out))
    return jax.random.uniform(rng, shape, jnp.float32, -bound, bound)


def init_params(rng, d_model):
    names = ["q", "k", "v", "o"]
    params = {}
    keys = jax.random.split(rng, 2 * len(names))
    for i, name in enumerate(names):
        params[f"w_{name}"] = xavier_uniform(keys[2 * i], (d_model, d_model))
        # The module zero-inits biases; use small non-zero biases in the test
        # harness so the kernels' bias path is actually exercised.
        params[f"b_{name}"] = 0.1 * jax.random.normal(
            keys[2 * i + 1], (d_model,), jnp.float32)
    return params


def ref_forward(p, q, k, v, h):
    B, S, D = q.shape
    d_k = D // h

    def lin(x, w, b):
        return x @ w.T + b

    qh = lin(q, p["w_q"], p["b_q"]).reshape(B, S, h, d_k).transpose(0, 2, 1, 3)
    kh = lin(k, p["w_k"], p["b_k"]).reshape(B, S, h, d_k).transpose(0, 2, 1, 3)
    vh = lin(v, p["w_v"], p["b_v"]).reshape(B, S, h, d_k).transpose(0, 2, 1, 3)
    s = jnp.einsum("bhqd,bhkd->bhqk", qh, kh) / math.sqrt(d_k)
    a = jax.nn.softmax(s, axis=-1)
    x = jnp.einsum("bhqk,bhkd->bhqd", a, vh).transpose(0, 2, 1, 3).reshape(B, S, D)
    return lin(x, p["w_o"], p["b_o"])


if __name__ == "__main__":
    B, S, d_model, h = 2, 8, 32, 4

    root = jax.random.PRNGKey(0)
    k_params, k_q, k_k, k_v = jax.random.split(root, 4)

    params = init_params(k_params, d_model)
    query = jax.random.normal(k_q, (B, S, d_model), jnp.float32)
    key   = jax.random.normal(k_k, (B, S, d_model), jnp.float32)
    value = jax.random.normal(k_v, (B, S, d_model), jnp.float32)

    prepped = prepare_params(params, h)
    out = multi_headed_attention(prepped, query, key, value, h)
    out = jax.block_until_ready(out)
    assert out.shape == (B, S, d_model)

    # Reference check in plain f32 JAX (kernels use bf16 matmul operands with
    # f32 accumulation, so tolerance is set for bf16 rounding).
    ref = ref_forward(params, query, key, value, h)
    err = float(jnp.max(jnp.abs(out - ref)))
    assert jnp.allclose(out, ref, atol=5e-2, rtol=5e-2), err

    print("KERNEL_OK")
</pallas_src>

<mosaic_0001>
module attributes {stable_mosaic.version = 11 : i64} {
  func.func @qkv_proj_kernel(%arg0: i32, %arg1: i32, %arg2: memref<1x8x32xf32, #tpu.memory_space<vmem>>, %arg3: memref<1x8x32xf32, #tpu.memory_space<vmem>>, %arg4: memref<1x8x32xf32, #tpu.memory_space<vmem>>, %arg5: memref<3x32x32xbf16, #tpu.memory_space<vmem>>, %arg6: memref<3x1x32xf32, #tpu.memory_space<vmem>>, %arg7: memref<1x8x32xbf16, #tpu.memory_space<vmem>>, %arg8: memref<1x8x32xbf16, #tpu.memory_space<vmem>>, %arg9: memref<1x8x32xbf16, #tpu.memory_space<vmem>>) attributes {dimension_semantics = [#tpu.dimension_semantics<parallel>, #tpu.dimension_semantics<parallel>], iteration_bounds = array<i64: 2, 1>, scalar_prefetch = 0 : i64, scratch_operands = 0 : i64, tpu.core_type = #tpu.core_type<tc>, window_params = [{transform_indices = @transform_0, window_bounds = array<i64: 1, 8, 32>}, {transform_indices = @transform_1, window_bounds = array<i64: 1, 8, 32>}, {transform_indices = @transform_2, window_bounds = array<i64: 1, 8, 32>}, {pipeline_mode = #tpu.pipeline_mode<synchronous>, transform_indices = @transform_3, window_bounds = array<i64: 3, 32, 32>}, {pipeline_mode = #tpu.pipeline_mode<synchronous>, transform_indices = @transform_4, window_bounds = array<i64: 3, 1, 32>}, {transform_indices = @transform_5, window_bounds = array<i64: 1, 8, 32>}, {transform_indices = @transform_6, window_bounds = array<i64: 1, 8, 32>}, {transform_indices = @transform_7, window_bounds = array<i64: 1, 8, 32>}]} {
    %c0 = arith.constant 0 : index
    %c0_0 = arith.constant 0 : index
    %c0_1 = arith.constant 0 : index
    %0 = vector.load %arg2[%c0, %c0_0, %c0_1] : memref<1x8x32xf32, #tpu.memory_space<vmem>>, vector<1x8x32xf32>
    %1 = vector.shape_cast %0 : vector<1x8x32xf32> to vector<8x32xf32>
    %2 = arith.truncf %1 : vector<8x32xf32> to vector<8x32xbf16>
    %c0_2 = arith.constant 0 : index
    %c0_3 = arith.constant 0 : index
    %c0_4 = arith.constant 0 : index
    %3 = vector.load %arg5[%c0_2, %c0_3, %c0_4] : memref<3x32x32xbf16, #tpu.memory_space<vmem>>, vector<1x32x32xbf16>
    %4 = vector.shape_cast %3 : vector<1x32x32xbf16> to vector<32x32xbf16>
    %cst = arith.constant dense<0.000000e+00> : vector<8x32xf32>
    %5 = tpu.matmul %2, %4, %cst {dimension_numbers = #tpu.dot_dimension_numbers<[1], [0], [0], [1], [0, 0, 1, 1], [], []>} : vector<8x32xbf16>, vector<32x32xbf16>, vector<8x32xf32> -> vector<8x32xf32>
    %c0_5 = arith.constant 0 : index
    %c0_6 = arith.constant 0 : index
    %c0_7 = arith.constant 0 : index
    %6 = vector.load %arg6[%c0_5, %c0_6, %c0_7] : memref<3x1x32xf32, #tpu.memory_space<vmem>>, vector<1x1x32xf32>
    %7 = vector.shape_cast %6 : vector<1x1x32xf32> to vector<1x32xf32>
    %8 = vector.broadcast %7 : vector<1x32xf32> to vector<8x32xf32>
    %9 = arith.addf %5, %8 : vector<8x32xf32>
    %10 = arith.truncf %9 : vector<8x32xf32> to vector<8x32xbf16>
    %c0_8 = arith.constant 0 : index
    %c0_9 = arith.constant 0 : index
    %c0_10 = arith.constant 0 : index
    %11 = vector.load %arg7[%c0_8, %c0_9, %c0_10] : memref<1x8x32xbf16, #tpu.memory_space<vmem>>, vector<1x8x32xbf16>
    %12 = vector.shape_cast %11 : vector<1x8x32xbf16> to vector<8x32xbf16>
    %13 = vector.shape_cast %10 : vector<8x32xbf16> to vector<1x8x32xbf16>
    tpu.vector_store %arg7[%c0_8, %c0_9, %c0_10], %13 {strides = array<i32>} : memref<1x8x32xbf16, #tpu.memory_space<vmem>>, vector<1x8x32xbf16>,
    %c0_11 = arith.constant 0 : index
    %c0_12 = arith.constant 0 : index
    %c0_13 = arith.constant 0 : index
    %14 = vector.load %arg3[%c0_11, %c0_12, %c0_13] : memref<1x8x32xf32, #tpu.memory_space<vmem>>, vector<1x8x32xf32>
    %15 = vector.shape_cast %14 : vector<1x8x32xf32> to vector<8x32xf32>
    %16 = arith.truncf %15 : vector<8x32xf32> to vector<8x32xbf16>
    %c1 = arith.constant 1 : index
    %c0_14 = arith.constant 0 : index
    %c0_15 = arith.constant 0 : index
    %17 = vector.load %arg5[%c1, %c0_14, %c0_15] : memref<3x32x32xbf16, #tpu.memory_space<vmem>>, vector<1x32x32xbf16>
    %18 = vector.shape_cast %17 : vector<1x32x32xbf16> to vector<32x32xbf16>
    %cst_16 = arith.constant dense<0.000000e+00> : vector<8x32xf32>
    %19 = tpu.matmul %16, %18, %cst_16 {dimension_numbers = #tpu.dot_dimension_numbers<[1], [0], [0], [1], [0, 0, 1, 1], [], []>} : vector<8x32xbf16>, vector<32x32xbf16>, vector<8x32xf32> -> vector<8x32xf32>
    %c1_17 = arith.constant 1 : index
    %c0_18 = arith.constant 0 : index
    %c0_19 = arith.constant 0 : index
    %20 = vector.load %arg6[%c1_17, %c0_18, %c0_19] : memref<3x1x32xf32, #tpu.memory_space<vmem>>, vector<1x1x32xf32>
    %21 = vector.shape_cast %20 : vector<1x1x32xf32> to vector<1x32xf32>
    %22 = vector.broadcast %21 : vector<1x32xf32> to vector<8x32xf32>
    %23 = arith.addf %19, %22 : vector<8x32xf32>
    %24 = arith.truncf %23 : vector<8x32xf32> to vector<8x32xbf16>
    %c0_20 = arith.constant 0 : index
    %c0_21 = arith.constant 0 : index
    %c0_22 = arith.constant 0 : index
    %25 = vector.load %arg8[%c0_20, %c0_21, %c0_22] : memref<1x8x32xbf16, #tpu.memory_space<vmem>>, vector<1x8x32xbf16>
    %26 = vector.shape_cast %25 : vector<1x8x32xbf16> to vector<8x32xbf16>
    %27 = vector.shape_cast %24 : vector<8x32xbf16> to vector<1x8x32xbf16>
    tpu.vector_store %arg8[%c0_20, %c0_21, %c0_22], %27 {strides = array<i32>} : memref<1x8x32xbf16, #tpu.memory_space<vmem>>, vector<1x8x32xbf16>,
    %c0_23 = arith.constant 0 : index
    %c0_24 = arith.constant 0 : index
    %c0_25 = arith.constant 0 : index
    %28 = vector.load %arg4[%c0_23, %c0_24, %c0_25] : memref<1x8x32xf32, #tpu.memory_space<vmem>>, vector<1x8x32xf32>
    %29 = vector.shape_cast %28 : vector<1x8x32xf32> to vector<8x32xf32>
    %30 = arith.truncf %29 : vector<8x32xf32> to vector<8x32xbf16>
    %c2 = arith.constant 2 : index
    %c0_26 = arith.constant 0 : index
    %c0_27 = arith.constant 0 : index
    %31 = vector.load %arg5[%c2, %c0_26, %c0_27] : memref<3x32x32xbf16, #tpu.memory_space<vmem>>, vector<1x32x32xbf16>
    %32 = vector.shape_cast %31 : vector<1x32x32xbf16> to vector<32x32xbf16>
    %cst_28 = arith.constant dense<0.000000e+00> : vector<8x32xf32>
    %33 = tpu.matmul %30, %32, %cst_28 {dimension_numbers = #tpu.dot_dimension_numbers<[1], [0], [0], [1], [0, 0, 1, 1], [], []>} : vector<8x32xbf16>, vector<32x32xbf16>, vector<8x32xf32> -> vector<8x32xf32>
    %c2_29 = arith.constant 2 : index
    %c0_30 = arith.constant 0 : index
    %c0_31 = arith.constant 0 : index
    %34 = vector.load %arg6[%c2_29, %c0_30, %c0_31] : memref<3x1x32xf32, #tpu.memory_space<vmem>>, vector<1x1x32xf32>
    %35 = vector.shape_cast %34 : vector<1x1x32xf32> to vector<1x32xf32>
    %36 = vector.broadcast %35 : vector<1x32xf32> to vector<8x32xf32>
    %37 = arith.addf %33, %36 : vector<8x32xf32>
    %38 = arith.truncf %37 : vector<8x32xf32> to vector<8x32xbf16>
    %c0_32 = arith.constant 0 : index
    %c0_33 = arith.constant 0 : index
    %c0_34 = arith.constant 0 : index
    %39 = vector.load %arg9[%c0_32, %c0_33, %c0_34] : memref<1x8x32xbf16, #tpu.memory_space<vmem>>, vector<1x8x32xbf16>
    %40 = vector.shape_cast %39 : vector<1x8x32xbf16> to vector<8x32xbf16>
    %41 = vector.shape_cast %38 : vector<8x32xbf16> to vector<1x8x32xbf16>
    tpu.vector_store %arg9[%c0_32, %c0_33, %c0_34], %41 {strides = array<i32>} : memref<1x8x32xbf16, #tpu.memory_space<vmem>>, vector<1x8x32xbf16>,
    return
  }
  func.func @transform_0(%arg0: i32, %arg1: i32) -> (i32, i32, i32) {
    %c0_i32 = arith.constant 0 : i32
    %c0_i32_0 = arith.constant 0 : i32
    return %arg0, %arg1, %c0_i32 : i32, i32, i32
  }
  func.func @transform_1(%arg0: i32, %arg1: i32) -> (i32, i32, i32) {
    %c0_i32 = arith.constant 0 : i32
    %c0_i32_0 = arith.constant 0 : i32
    return %arg0, %arg1, %c0_i32 : i32, i32, i32
  }
  func.func @transform_2(%arg0: i32, %arg1: i32) -> (i32, i32, i32) {
    %c0_i32 = arith.constant 0 : i32
    %c0_i32_0 = arith.constant 0 : i32
    return %arg0, %arg1, %c0_i32 : i32, i32, i32
  }
  func.func @transform_3(%arg0: i32, %arg1: i32) -> (i32, i32, i32) {
    %c0_i32 = arith.constant 0 : i32
    %c0_i32_0 = arith.constant 0 : i32
    %c0_i32_1 = arith.constant 0 : i32
    %c0_i32_2 = arith.constant 0 : i32
    return %c0_i32, %c0_i32_0, %c0_i32_1 : i32, i32, i32
  }
  func.func @transform_4(%arg0: i32, %arg1: i32) -> (i32, i32, i32) {
    %c0_i32 = arith.constant 0 : i32
    %c0_i32_0 = arith.constant 0 : i32
    %c0_i32_1 = arith.constant 0 : i32
    %c0_i32_2 = arith.constant 0 : i32
    return %c0_i32, %c0_i32_0, %c0_i32_1 : i32, i32, i32
  }
  func.func @transform_5(%arg0: i32, %arg1: i32) -> (i32, i32, i32) {
    %c0_i32 = arith.constant 0 : i32
    %c0_i32_0 = arith.constant 0 : i32
    return %arg0, %arg1, %c0_i32 : i32, i32, i32
  }
  func.func @transform_6(%arg0: i32, %arg1: i32) -> (i32, i32, i32) {
    %c0_i32 = arith.constant 0 : i32
    %c0_i32_0 = arith.constant 0 : i32
    return %arg0, %arg1, %c0_i32 : i32, i32, i32
  }
  func.func @transform_7(%arg0: i32, %arg1: i32) -> (i32, i32, i32) {
    %c0_i32 = arith.constant 0 : i32
    %c0_i32_0 = arith.constant 0 : i32
    return %arg0, %arg1, %c0_i32 : i32, i32, i32
  }
}

</mosaic_0001>

<bundles_post_ra>
// kernel: tpu_custom_call.1
= control target key start
LH: loop header
LB: loop body
LE: loop exit
PB: predicated region body
PF: predicated region fallthrough
CT: control target
= control target key end

     0   :  { %s1786_s0 = inlined_call_operand.hbm [shape: f32[2,8,32], index: 0, kind: input, shape index: {}]   ;;  %s1787_s1 = inlined_call_operand.hbm [shape: f32[2,8,32], index: 1, kind: input, shape index: {}]   ;;  %s1788_s2 = inlined_call_operand.hbm [shape: f32[2,8,32], index: 2, kind: input, shape index: {}]   ;;  %s1789_s3 = inlined_call_operand.hbm [shape: bf16[3,32,32], index: 3, kind: input, shape index: {}]   ;;  %s1790_s4 = inlined_call_operand.vmem [shape: f32[3,1,32], index: 4, kind: input, shape index: {}]   ;;  %s1791_s5 = inlined_call_operand.hbm [shape: bf16[2,8,32], index: 5, kind: output, shape index: {0}]   ;;  %s1792_s6 = inlined_call_operand.hbm [shape: bf16[2,8,32], index: 6, kind: output, shape index: {1}]   ;;  %s1793_s7 = inlined_call_operand.hbm [shape: bf16[2,8,32], index: 7, kind: output, shape index: {2}]  }
   0x1   :  { %1816 = sst [smem:[#allocation26_spill]] %s1787_s1 }
   0x2   :  { %1817 = sst [smem:[#allocation27_spill]] %s1791_s5 }
   0x3   :  { %1818 = sst [smem:[#allocation28_spill]] %s1792_s6 }
   0x4   :  { %1819 = sst [smem:[#allocation29_spill]] %s1793_s7 }
   0x5   :  { %13 = vsyncpa [#allocation3], 0 }
   0x6   :  { %15 = vsyncpa [#allocation3 + $0x1], 0 }
   0x7   :  { %16 = vsyncpa [#allocation6], 0 }
   0x8   :  { %18 = vsyncpa [#allocation6 + $0x1], 0 }
   0x9   :  { %19 = vsyncpa [#allocation9], 0 }
   0xa   :  { %20 = vsyncpa [#allocation4], 0 }
   0xb   :  { %22 = vsyncpa [#allocation4 + $0x1], 0 }
   0xc   :  { %23 = vsyncpa [#allocation12], 0 }
   0xd   :  { %25 = vsyncpa [#allocation12 + $0x1], 0  ;;  %s1391_s24 = smov 0   ;;  %s1393_s25 = smov 0  }
   0xe   :  { %s1395_s26 = smov 0   ;;  %s1397_s27 = smov 0  }
   0xf   :  { %s1399_s28 = smov 0   ;;  %s1401_s29 = smov 0  }
  0x10 LB: > { %1820 = sst [smem:[#allocation19_spill]] %s1318_s24  ;;  %s43_s30 = sadd.s32 1, %s1334_s28  ;;  %s1338_s29 = sphi %s1401_s29, %s31_s29   ;;  %s1334_s28 = sphi %s1399_s28, %s1857_s28   ;;  %s1330_s27 = sphi %s1397_s27, %s1856_s27   ;;  %s1326_s26 = sphi %s1395_s26, %s1860_s26   ;;  %s1322_s25 = sphi %s1393_s25, %s1859_s25   ;;  %s1318_s24 = sphi %s1391_s24, %s1858_s24  }
  0x11   : > { %1821 = sst [smem:[#allocation20_spill]] %s1334_s28  ;;  %s52_s8 = sadd.s32 1, %s1326_s26 }
  0x12   : > { %1822 = sst [smem:[#allocation21_spill]] %s1338_s29  ;;  %p45_p0 = scmp.ge.s32.totalorder %s43_s30, 2 }
  0x13   : > { %p1794_p1 = scmp.ne.s32.totalorder %s1326_s26, %s1322_s25  ;;  %p60_p2 = scmp.eq.s32.totalorder %s1338_s29, 0 }
  0x14   : > { %s1862_s30 = smov (%p45_p0, %s43_s30), 0  ;;  %p1008_p5 = scmp.lt.s32.totalorder %s1338_s29, 2 }
  0x15   : > { %1823 = sst [smem:[#allocation22_spill]] %s1862_s30  ;;  %p61_p4 = por %p60_p2, %p1794_p1 }
  0x16   : > { %s47_s9 = ssub.s32 %s1334_s28, %s1862_s30  ;;  %s1796_s10 = sand.u32 1, %s1326_s26  }
  0x17   : > { %p50_p6 = scmp.eq.s32.totalorder %s47_s9, 0  ;;  %s1438_s11 = sshll.u32 %s1796_s10, 3 }
  0x18   : > { %s1441_s12 = sshll.u32 %s1334_s28, 7  ;;  %p1443_p7 = pnand %p1008_p5, %p61_p4 }
  0x19   : > { %s1448_s14 = scalar_select %p50_p6, %s1326_s26, %s52_s8  }
  0x1a   : > { %s1824_s13 = scalar_select %p1443_p7, 1, 0 }
  0x1b   : > { %1825 = sst [smem:[#allocation23_spill]] %s1448_s14  ;;  %s306_s15 = sand.u32 1, %s1338_s29  }
  0x1c   : > { %s1826_s1 = sld [smem:[#allocation26_spill]]  ;;  %s310_s19 = scalar_lea.vmem [#allocation5], %s1438_s11 }
  0x1d   : > { %s318_s20 = sshll.u32 %s310_s19, 4  ;;  %s1460_s21 = scalar_lea.sflag [#allocation6], %s306_s15  ;;  %s1458_s20 = int_to_ptr.vmem [resolvable:$true] %s318_s20 }
  0x1e   : > { %p1466_p9 = pneg %p1443_p7 }
  0x20   : > { %s1827_s23 = scalar_select %p1466_p9, 1, 0 }
  0x22   : > { %s1455_s18 = scalar_lea.hbm %s1826_s1, %s1441_s12  ;;  %s1075_s16 = scalar_lea.hbm %s1826_s1, 256 }
  0x23   : > { %s1070_s22 = scalar_lea.hbm %s1455_s18, 128  ;;  %p1076_p12 = scmp.lt.u32.totalorder %s1455_s18, %s1826_s1 }
  0x24   : > { %p1071_p8 = scmp.ne.s32.totalorder %s1455_s18, %s1070_s22  ;;  %p1077_p13 = scmp.lt.u32.totalorder %s1075_s16, %s1070_s22 }
  0x25   : > { %p1079_p2 = scmp.lt.u32.totalorder %s1070_s22, %s1455_s18 }
  0x26   : > { %p1073_p10 = pnand %p1466_p9, %p1071_p8  ;;  %p1078_p0 = por %p1077_p13, %p1076_p12 }
  0x28   : > { %p1074_p11 = pneg %p1073_p10  ;;  %p1080_p4 = por %p1079_p2, %p1078_p0 }
  0x2a   : > { %p1081_p5 = pnand %p1080_p4, %p1074_p11 }
  0x2c   : > { %1084 = shalt.err (!%p1081_p5)
}
  0x2d   : > { %s1085_s15 = scalar_lea.vmem %s1458_s20, 128  ;;  %s1340_s8 = smov [#allocation5]  }
  0x2e   : > { %p1086_p6 = scmp.ne.s32.totalorder %s1458_s20, %s1085_s15  ;;  %s1090_s9 = sshll.u32 %s1340_s8, 4  ;;  %s1091_s9 = int_to_ptr.vmem [resolvable:$false] %s1090_s9 }
  0x2f   : > { %s1092_s17 = scalar_lea.vmem %s1091_s9, 256  ;;  %p1093_p3 = scmp.lt.s32.totalorder %s1458_s20, %s1091_s9 }
  0x30   : > { %p1088_p8 = pnand %p1086_p6, %p1466_p9  ;;  %p1094_p1 = scmp.lt.s32.totalorder %s1092_s17, %s1085_s15 }
  0x32   : > { %p1089_p10 = pneg %p1088_p8  ;;  %p1095_p12 = por %p1094_p1, %p1093_p3 }
  0x34   : > { %p1096_p13 = pnand %p1095_p12, %p1089_p10 }
  0x36   : > { %1099 = shalt.err (!%p1096_p13)
}
  0x37   : > { %993 = dma.hbm_to_vmem [thread:$0]  (!%p1443_p7), %s1455_s18, 128, %s1458_s20, %s1460_s21  }
  0x38   : > { %s1491_s22 = sadd.s32 4294967295, %s1338_s29   ;;  %s1795_s16 = sadd.s32 4294967294, %s1338_s29  }
  0x39   : > { %p65_p1 = scmp.ne.s32.totalorder %s1322_s25, %s1318_s24  ;;  %p1803_p3 = scmp.eq.s32.totalorder %s1491_s22, 0 }
  0x3a   : > { %p189_p11 = scmp.eq.s32.totalorder %s1491_s22, 1  ;;  %p195_p0 = scmp.eq.s32.totalorder %s1795_s16, 1 }
  0x3b   : > { %p895_p2 = scmp.ge.s32.totalorder %s1338_s29, 1  ;;  %p1503_p4 = por %p1803_p3, %p65_p1 }
  0x3c   : > { %p1829_p5 = scmp.ne.s32.totalorder %s1326_s26, %s1322_s25  ;;  %p1514_p8 = por %p195_p0, %p65_p1 }
  0x3d   : > { %s1828_s19 = scalar_select %p1503_p4, 1, 0 }
  0x3e   : > { %p1510_p6 = por %p189_p11, %p1829_p5  ;;  %p258_p10 = scmp.lt.s32.totalorder %s1338_s29, 3 }
  0x3f   : > { %s1832_s20 = scalar_select %p1514_p8, 1, 0 }
  0x40   : > { %s1830_s18 = scalar_select %p1510_p6, 1, 0 }
  0x41   : > { %1833 = sst [smem:[#allocation25_spill]] %s1832_s20  ;;  %p1519_p12 = pnand %p895_p2, %p258_p10 }
  0x42   : > { %1831 = sst [smem:[#allocation24_spill]] %s1830_s18  ;;  %s1341_s8 = smov [#allocation8]  }
  0x43   : > { %s1834_s15 = scalar_select %p1519_p12, 1, 0 }
  0x44   : > { %s270_s9 = sshll.u32 %s1341_s8, 4  ;;  %p983_p13 = pneg %p1519_p12  ;;  %s1523_s9 = int_to_ptr.vmem [resolvable:$true] %s270_s9 }
  0x45   : > { %s1537_s1 = scalar_lea.hbm %s1786_s0, %s1441_s12  ;;  %s291_s30 = scalar_lea.vmem [#allocation2], %s1438_s11 }
  0x46   : > { %p1529_p11 = pnand %p983_p13, %p1803_p3  ;;  %s299_s28 = sshll.u32 %s291_s30, 4  ;;  %s1540_s28 = int_to_ptr.vmem [resolvable:$true] %s299_s28 }
  0x47   : > { %s1100_s29 = scalar_lea.hbm %s1789_s3, 768 }
  0x48   : > { %p1101_p1 = scmp.ne.s32.totalorder %s1789_s3, %s1100_s29  ;;  %p1102_p0 = pneg %p1529_p11 }
  0x49   : > { %p1107_p10 = scmp.lt.u32.totalorder %s1100_s29, %s1789_s3 }
  0x4a   : > { %p1103_p2 = pnand %p1102_p0, %p1101_p1 }
  0x4c   : > { %p1104_p5 = pneg %p1103_p2 }
  0x4e   : > { %p1109_p13 = pnand %p1107_p10, %p1104_p5 }
  0x50   : > { %1112 = shalt.err (!%p1109_p13)
}
  0x51   : > { %s1113_s30 = scalar_lea.vmem %s1523_s9, 768  ;;  %p1121_p4 = scmp.lt.s32.totalorder %s1523_s9, %s1523_s9 }
  0x52   : > { %p1114_p3 = scmp.ne.s32.totalorder %s1523_s9, %s1113_s30  ;;  %p1122_p12 = scmp.lt.s32.totalorder %s1113_s30, %s1113_s30 }
  0x54   : > { %p1116_p8 = pnand %p1114_p3, %p1102_p0  ;;  %p1123_p7 = por %p1122_p12, %p1121_p4 }
  0x56   : > { %p1117_p6 = pneg %p1116_p8 }
  0x58   : > { %p1124_p9 = pnand %p1123_p7, %p1117_p6 }
  0x5a   : > { %1127 = shalt.err (!%p1124_p9)
}
  0x5b   : > { %s1342_s24 = smov 64   ;;  %s1343_s29 = smov 4  }
  0x5c   : > { %986 = dma.hbm_to_vmem [thread:$0]  (!%p1529_p11), %s1789_s3, 768, %s1523_s9, [#allocation9], %s1342_s24, %s1342_s24, %s1343_s29  }
  0x5d   : > { %s1836_s8 = sand.u32 1, %s1326_s26   ;;  %s1128_s16 = scalar_lea.hbm %s1537_s1, 128 }
  0x5e   : > { %s288_s10 = scalar_lea.sflag [#allocation3], %s1836_s8  ;;  %p1129_p7 = scmp.ne.s32.totalorder %s1537_s1, %s1128_s16 }
  0x5f   : > { %p1837_p9 = scmp.ne.s32.totalorder %s1827_s23, 0  ;;  %s1133_s6 = scalar_lea.hbm %s1786_s0, 256 }
  0x60   : > { %p1134_p6 = scmp.lt.u32.totalorder %s1537_s1, %s1786_s0  ;;  %p1135_p8 = scmp.lt.u32.totalorder %s1133_s6, %s1128_s16 }
  0x61   : > { %p1131_p3 = pnand %p1129_p7, %p1837_p9  ;;  %p1137_p1 = scmp.lt.u32.totalorder %s1128_s16, %s1537_s1 }
  0x62   : > { %p1136_p12 = por %p1135_p8, %p1134_p6 }
  0x63   : > { %p1132_p4 = pneg %p1131_p3 }
  0x64   : > { %p1138_p0 = por %p1137_p1, %p1136_p12 }
  0x66   : > { %p1139_p11 = pnand %p1138_p0, %p1132_p4 }
  0x68   : > { %1142 = shalt.err (!%p1139_p11)
}
  0x69   : > { %s1143_s9 = scalar_lea.vmem %s1540_s28, 128  ;;  %s1344_s7 = smov [#allocation2]  }
  0x6a   : > { %p1144_p2 = scmp.ne.s32.totalorder %s1540_s28, %s1143_s9  ;;  %s1148_s17 = sshll.u32 %s1344_s7, 4  ;;  %s1149_s17 = int_to_ptr.vmem [resolvable:$false] %s1148_s17 }
  0x6b   : > { %s1150_s5 = scalar_lea.vmem %s1149_s17, 256  ;;  %p1151_p13 = scmp.lt.s32.totalorder %s1540_s28, %s1149_s17 }
  0x6c   : > { %p1146_p5 = pnand %p1144_p2, %p1837_p9  ;;  %p1152_p7 = scmp.lt.s32.totalorder %s1150_s5, %s1143_s9 }
  0x6e   : > { %p1147_p10 = pneg %p1146_p5  ;;  %p1153_p3 = por %p1152_p7, %p1151_p13 }
  0x70   : > { %p1154_p6 = pnand %p1153_p3, %p1147_p10 }
  0x72   : > { %1157 = shalt.err (!%p1154_p6)
}
  0x73   : > { %p1838_p4 = scmp.ne.s32.totalorder %s1824_s13, 0  ;;  %s1590_s24 = scalar_lea.hbm %s1788_s2, %s1441_s12 }
  0x74   : > { %s329_s29 = scalar_lea.vmem [#allocation7], %s1438_s11  ;;  %s1158_s20 = scalar_lea.hbm %s1590_s24, 128 }
  0x75   : > { %990 = dma.hbm_to_vmem [thread:$0]  (!%p1838_p4), %s1537_s1, 128, %s1540_s28, %s288_s10  }
  0x76   : > { %s337_s14 = sshll.u32 %s329_s29, 4  ;;  %p1159_p8 = scmp.ne.s32.totalorder %s1590_s24, %s1158_s20  ;;  %s338_s14 = int_to_ptr.vmem [resolvable:$true] %s337_s14 }
  0x77   : > { %s1163_s1 = scalar_lea.hbm %s1788_s2, 256  ;;  %p1164_p0 = scmp.lt.u32.totalorder %s1590_s24, %s1788_s2 }
  0x78   : > { %p1161_p12 = pnand %p1159_p8, %p1837_p9  ;;  %p1165_p11 = scmp.lt.u32.totalorder %s1163_s1, %s1158_s20 }
  0x79   : > { %p1167_p5 = scmp.lt.u32.totalorder %s1158_s20, %s1590_s24 }
  0x7a   : > { %p1162_p1 = pneg %p1161_p12  ;;  %p1166_p2 = por %p1165_p11, %p1164_p0 }
  0x7c   : > { %p1168_p10 = por %p1167_p5, %p1166_p2 }
  0x7e   : > { %p1169_p13 = pnand %p1168_p10, %p1162_p1 }
  0x80   : > { %1172 = shalt.err (!%p1169_p13)
}
  0x81   : > { %s1173_s11 = scalar_lea.vmem %s338_s14, 128  ;;  %s1345_s12 = smov [#allocation7]  }
  0x82   : > { %p1174_p7 = scmp.ne.s32.totalorder %s338_s14, %s1173_s11  ;;  %s1178_s30 = sshll.u32 %s1345_s12, 4  ;;  %s1179_s30 = int_to_ptr.vmem [resolvable:$false] %s1178_s30 }
  0x83   : > { %s1180_s9 = scalar_lea.vmem %s1179_s30, 256  ;;  %p1181_p8 = scmp.lt.s32.totalorder %s338_s14, %s1179_s30 }
  0x84   : > { %p1176_p3 = pnand %p1174_p7, %p1837_p9  ;;  %p1182_p12 = scmp.lt.s32.totalorder %s1180_s9, %s1173_s11 }
  0x86   : > { %p1177_p6 = pneg %p1176_p3  ;;  %p1183_p4 = por %p1182_p12, %p1181_p8 }
  0x88   : > { %p1184_p0 = pnand %p1183_p4, %p1177_p6 }
  0x8a   : > { %1187 = shalt.err (!%p1184_p0)
}
  0x8b   : > { %p1839_p11 = scmp.ne.s32.totalorder %s1824_s13, 0  ;;  %p1840_p1 = scmp.ne.s32.totalorder %s1834_s15, 0 }
  0x8c   : > { %s1614_s23 = sand.u32 (!%p1840_p1), 1, %s1322_s25   ;;  %p1841_p9 = scmp.ne.s32.totalorder (!%p1840_p1), %s1828_s19, 0 }
  0x8d   : > { %996 = dma.hbm_to_vmem [thread:$0]  (!%p1839_p11), %s1590_s24, 128, %s338_s14, %s1460_s21  }
  0x8e   : > { %346 = sbr.rel (%p1840_p1) target bundleno = 443 (0x1bb), region = 40  ;;  %s1617_s7 = sshll.u32 (!%p1840_p1), %s1614_s23, 3 }
  0x8f   : > { %s349_s17 = scalar_lea.sflag (!%p1840_p1), [#allocation3], %s1614_s23  ;;  %s352_s5 = scalar_lea.vmem (!%p1840_p1), [#allocation2], %s1617_s7 }
  0x95   : > { %1297 = dma.done.wait (%p1841_p9), %s349_s17, 128  }
  0x96   : > { %1299 = vsyncadd (%p1841_p9), %s349_s17, 4294967168  ;;  %s357_s13 = sand.u32 1, %s1491_s22   ;;  %s361_s15 = scalar_lea.vmem [#allocation5], %s1617_s7 }
  0x97   : > { %s358_s21 = scalar_lea.sflag [#allocation6], %s357_s13 }
  0x98   : > { %1301 = dma.done.wait (%p1841_p9), %s358_s21, 256  }
  0x99   : > { %1303 = vsyncadd (%p1841_p9), %s358_s21, 4294967040  ;;  %s370_s6 = scalar_lea.vmem [#allocation7], %s1617_s7  ;;  %p1842_p4 = scmp.eq.s32.totalorder %s1491_s22, 0 }
  0x9b   : > { %1305 = dma.done.wait (%p1842_p4), [#allocation9], 768   ;;  %p1843_p2 = pmov %p1842_p4 }
  0x9c   : > { %v1346_v0 = vmov 0.0   ;;  %vm1347_vm0 = vmmov 0   ;;  %v1064_v1 = vld [vmem:[#allocation8] sm:$0xff]   ;;  %v1065_v2 = vld [vmem:[#allocation8 + $0x8] sm:$0xff]   ;;  %v1066_v3 = vld [vmem:[#allocation8 + $0x10] sm:$0xff]   ;;  %vm451_vm1 = vcmask 261120  }
  0x9d   : > { %1307 = vsyncadd (%p1843_p2), [#allocation9], 4294966528  ;;  %943 = vmatprep.subr.bf16.mxu0 %v1346_v0  ;;  %951 = vmatprep.subr.bf16.mxu1 %v1346_v0  ;;  %v426_v4 = vld [vmem:[%s352_s5] sm:$0xff]  ;;  %v498_v7 = vld [vmem:[%s361_s15] sm:$0xff]  ;;  %s1642_s19 = sshll.u32 %s1614_s23, 2  ;;  %s1651_s20 = sshll.u32 %s1330_s27, 6 }
  0x9e   : > { %947 = vmatprep.mubr.msk.bf16.mxu0 %vm1347_vm0, %v1346_v0  ;;  %955 = vmatprep.mubr.msk.bf16.mxu1 %vm1347_vm0, %v1346_v0  ;;  %v427_v5 = vpack.c.bf16 %v426_v4, %v426_v4  ;;  %v1068_v6 = vld [vmem:[#allocation8 + $0x18] sm:$0xff]   ;;  %v1067_v8 = vld [vmem:[#allocation8 + $0x20] sm:$0xff]   ;;  %v499_v9 = vpack.c.bf16 %v498_v7, %v498_v7  ;;  %v1069_v10 = vld [vmem:[#allocation8 + $0x28] sm:$0xff]   ;;  %s410_s8 = scalar_lea.vmem [#allocation10], %s1642_s19  ;;  %vm496_vm2 = vcmask 257024   ;;  %s417_s1 = scalar_lea.vmem [#allocation11], %s1642_s19 }
  0x9f   : > { %944 = vmatpush3.bf16.msra.mxu0 %v1064_v1  ;;  %952 = vmatpush3.bf16.msra.mxu1 %v1066_v3  ;;  %v570_v11 = vld [vmem:[%s370_s6] sm:$0xff]  ;;  %s667_s16 = sshll.u32 %s410_s8, 4  ;;  %s681_s28 = sshll.u32 %s417_s1, 4  ;;  %s1663_s16 = int_to_ptr.vmem [resolvable:$true] %s667_s16  ;;  %s1671_s28 = int_to_ptr.vmem [resolvable:$true] %s681_s28 }
  0xa0   : > { %945 = vmatprep.subr.bf16.mxu0 %v1346_v0  ;;  %953 = vmatprep.subr.bf16.mxu1 %v1346_v0  ;;  %v571_v12 = vpack.c.bf16 %v570_v11, %v570_v11  ;;  %v912_v13 = vld [vmem:[%s1790_s4] ss:$0 sm:$0xff]  ;;  %v917_v15 = vld [vmem:[%s1790_s4 + $0x1] ss:$0 sm:$0xff]  ;;  %s1844_s10 = sld [smem:[#allocation24_spill]]  ;;  %s1846_s17 = sld [smem:[#allocation28_spill]] }
  0xa1   : > { %s1845_s12 = sld [smem:[#allocation27_spill]]  ;;  %v922_v27 = vld [vmem:[%s1790_s4 + $0x2] ss:$0 sm:$0xff]  ;;  %s643_s6 = scalar_lea.sflag [#allocation4], %s1614_s23 }
  0xa2   : > { %s1188_s18 = scalar_lea.vmem %s1663_s16, 64  ;;  %s1348_s24 = smov [#allocation10]  }
  0xa3   : > { %946 = vmatpush3.bf16.msra.mxu0 %v1065_v2  ;;  %954 = vmatpush3.bf16.msra.mxu1 %v1068_v6  ;;  %p1189_p5 = scmp.ne.s32.totalorder %s1663_s16, %s1188_s18  ;;  %s1192_s29 = sshll.u32 %s1348_s24, 4  ;;  %s1193_s29 = int_to_ptr.vmem [resolvable:$false] %s1192_s29 }
  0xa4   : > { %959 = vmatprep.subr.bf16.mxu0 %v1346_v0  ;;  %s1194_s14 = scalar_lea.vmem %s1193_s29, 128  ;;  %p1195_p3 = scmp.lt.s32.totalorder %s1663_s16, %s1193_s29 }
  0xa5   : > { %p1196_p6 = scmp.lt.s32.totalorder %s1194_s14, %s1188_s18 }
  0xa6   : > { %948 = vmatmul.mubr.msk.bf16.vlgmr.msra.gmra.mrb[0].mxu0 %vm451_vm1, %v427_v5  ;;  %956 = vmatmul.mubr.msk.bf16.vlgmr.msra.gmra.mrb[0].mxu1 %vm451_vm1, %v499_v9  ;;  %s1669_s5 = scalar_lea.hbm %s1846_s17, %s1651_s20  ;;  %p1847_p10 = scmp.ne.s32.totalorder %s1844_s10, 0 }
  0xa7   : > { %960 = vmatpush3.bf16.msra.mxu0 %v1067_v8  ;;  %963 = vmatprep.mubr.msk.bf16.mxu0 %vm1347_vm0, %v1346_v0  ;;  %s1661_s30 = scalar_lea.hbm %s1845_s12, %s1651_s20  ;;  %p1197_p8 = por %p1196_p6, %p1195_p3 }
  0xa8   : > { %961 = vmatprep.subr.bf16.mxu0 %v1346_v0  ;;  %p1190_p13 = pnand %p1189_p5, %p1847_p10 }
  0xaa   : > { %p1191_p7 = pneg %p1190_p13 }
  0xab   : > { %962 = vmatpush3.bf16.msra.mxu0 %v1069_v10 }
  0xac   : > { %p1198_p12 = pnand %p1197_p8, %p1191_p7 }
  0xae   : > { %964 = vmatmul.mubr.msk.bf16.vlgmr.msra.gmra.mrb[4].mxu0 %vm451_vm1, %v571_v12 }
 0x179   : > { %v489_v14 = vpop.f32.mrb[0].mxu0  ;;  %v562_v19 = vpop.f32.mrb[0].mxu1 }
 0x17a   : > { %v490_v16 = vadd.f32 %v912_v13, %v489_v14  ;;  %v949_v17 = vpop.f32.mrb[1].mxu0  ;;  %v563_v22 = vadd.f32 %v917_v15, %v562_v19  ;;  %v957_v23 = vpop.f32.mrb[1].mxu1 }
 0x17b   : > { %v492_v18 = vpop.f32.mrb[2].mxu0  ;;  %v565_v24 = vpop.f32.mrb[2].mxu1 }
 0x17c   : > { %v495_v20 = vpack.c.bf16 %v490_v16, %v490_v16  ;;  %v950_v21 = vpop.f32.mrb[3].mxu0  ;;  %v568_v25 = vpack.c.bf16 %v563_v22, %v563_v22  ;;  %v958_v26 = vpop.f32.mrb[3].mxu1 }
 0x17e   : > { %497 = vst.msk [vmem:[%s410_s8] sm:$0xf] %vm496_vm2, %v495_v20 }
 0x17f   : > { %1201 = shalt.err (!%p1198_p12)
}
 0x180   : > { %s1202_s23 = scalar_lea.hbm %s1661_s30, 64  ;;  %s1206_s11 = scalar_lea.hbm %s1845_s12, 128 }
 0x181   : > { %p1203_p0 = scmp.ne.s32.totalorder %s1661_s30, %s1202_s23  ;;  %p1207_p9 = scmp.lt.u32.totalorder %s1661_s30, %s1845_s12 }
 0x182   : > { %p1208_p4 = scmp.lt.u32.totalorder %s1206_s11, %s1202_s23  ;;  %p1210_p5 = scmp.lt.u32.totalorder %s1202_s23, %s1661_s30 }
 0x183   : > { %p1204_p11 = pnand %p1203_p0, %p1847_p10 }
 0x184   : > { %p1209_p2 = por %p1208_p4, %p1207_p9 }
 0x185   : > { %p1205_p1 = pneg %p1204_p11 }
 0x186   : > { %p1211_p13 = por %p1210_p5, %p1209_p2 }
 0x188   : > { %p1212_p7 = pnand %p1211_p13, %p1205_p1 }
 0x18a   : > { %1215 = shalt.err (!%p1212_p7)
}
 0x18b   : > { %977 = dma.vmem_to_hbm [thread:$0]  (%p1847_p10), %s1663_s16, 64, %s1661_s30, %s643_s6   ;;  %569 = vst.msk [vmem:[%s417_s1] sm:$0xf] %vm496_vm2, %v568_v25  ;;  %v634_v28 = vpop.f32.mrb[4].mxu0 }
 0x18c   : > { %s424_s21 = scalar_lea.vmem [#allocation13], %s1642_s19  ;;  %s1709_s18 = scalar_lea.sflag [#allocation12], %s357_s13 }
 0x18d   : > { %s1705_s15 = sshll.u32 %s424_s21, 4  ;;  %s1216_s24 = scalar_lea.vmem %s1671_s28, 64  ;;  %s696_s15 = int_to_ptr.vmem [resolvable:$true] %s1705_s15 }
 0x18e   : > { %p1217_p3 = scmp.ne.s32.totalorder %s1671_s28, %s1216_s24  ;;  %s1349_s29 = smov [#allocation11]  }
 0x18f   : > { %s1220_s14 = sshll.u32 %s1349_s29, 4  ;;  %s1221_s14 = int_to_ptr.vmem [resolvable:$false] %s1220_s14 }
 0x190   : > { %p1218_p6 = pnand %p1217_p3, %p1847_p10  ;;  %s1222_s16 = scalar_lea.vmem %s1221_s14, 128 }
 0x191   : > { %p1223_p12 = scmp.lt.s32.totalorder %s1671_s28, %s1221_s14  ;;  %p1224_p0 = scmp.lt.s32.totalorder %s1222_s16, %s1216_s24 }
 0x192   : > { %p1219_p8 = pneg %p1218_p6 }
 0x193   : > { %p1225_p11 = por %p1224_p0, %p1223_p12 }
 0x195   : > { %p1226_p1 = pnand %p1225_p11, %p1219_p8 }
 0x197   : > { %1229 = shalt.err (!%p1226_p1)
}
 0x198   : > { %s1230_s22 = scalar_lea.hbm %s1669_s5, 64  ;;  %s1234_s30 = scalar_lea.hbm %s1846_s17, 128 }
 0x199   : > { %p1231_p9 = scmp.ne.s32.totalorder %s1669_s5, %s1230_s22  ;;  %p1235_p5 = scmp.lt.u32.totalorder %s1669_s5, %s1846_s17 }
 0x19a   : > { %p1236_p13 = scmp.lt.u32.totalorder %s1234_s30, %s1230_s22  ;;  %p1238_p3 = scmp.lt.u32.totalorder %s1230_s22, %s1669_s5 }
 0x19b   : > { %p1232_p4 = pnand %p1231_p9, %p1847_p10 }
 0x19c   : > { %p1237_p7 = por %p1236_p13, %p1235_p5 }
 0x19d   : > { %p1233_p2 = pneg %p1232_p4 }
 0x19e   : > { %p1239_p6 = por %p1238_p3, %p1237_p7 }
 0x1a0   : > { %p1240_p8 = pnand %p1239_p6, %p1233_p2 }
 0x1a2   : > { %1243 = shalt.err (!%p1240_p8)
}
 0x1a3   : > { %978 = dma.vmem_to_hbm [thread:$0]  (%p1847_p10), %s1671_s28, 64, %s1669_s5, %s1709_s18   ;;  %v635_v29 = vadd.f32 %v922_v27, %v634_v28  ;;  %v965_v30 = vpop.f32.mrb[5].mxu0 }
 0x1a4   : > { %v637_v31 = vpop.f32.mrb[6].mxu0  ;;  %s1848_s11 = sld [smem:[#allocation29_spill]]  ;;  %s1244_s7 = scalar_lea.vmem %s696_s15, 64 }
 0x1a5   : > { %v640_v32 = vpack.c.bf16 %v635_v29, %v635_v29  ;;  %v966_v33 = vpop.f32.mrb[7].mxu0  ;;  %p1245_p12 = scmp.ne.s32.totalorder %s696_s15, %s1244_s7  ;;  %s1350_s28 = smov [#allocation13]  }
 0x1a6   : > { %s1248_s5 = sshll.u32 %s1350_s28, 4  ;;  %s1249_s5 = int_to_ptr.vmem [resolvable:$false] %s1248_s5 }
 0x1a7   : > { %641 = vst.msk [vmem:[%s424_s21] sm:$0xf] %vm496_vm2, %v640_v32  ;;  %p1246_p0 = pnand %p1245_p12, %p1847_p10  ;;  %s1250_s24 = scalar_lea.vmem %s1249_s5, 128 }
 0x1a8   : > { %p1251_p1 = scmp.lt.s32.totalorder %s696_s15, %s1249_s5  ;;  %p1252_p9 = scmp.lt.s32.totalorder %s1250_s24, %s1244_s7 }
 0x1a9   : > { %p1247_p11 = pneg %p1246_p0 }
 0x1aa   : > { %s1737_s9 = scalar_lea.hbm %s1848_s11, %s1651_s20  ;;  %p1253_p4 = por %p1252_p9, %p1251_p1 }
 0x1ac   : > { %p1254_p2 = pnand %p1253_p4, %p1247_p11 }
 0x1ae   : > { %1257 = shalt.err (!%p1254_p2)
}
 0x1af   : > { %s1258_s19 = scalar_lea.hbm %s1737_s9, 64  ;;  %s1262_s29 = scalar_lea.hbm %s1848_s11, 128 }
 0x1b0   : > { %p1259_p5 = scmp.ne.s32.totalorder %s1737_s9, %s1258_s19  ;;  %p1263_p3 = scmp.lt.u32.totalorder %s1737_s9, %s1848_s11 }
 0x1b1   : > { %p1264_p6 = scmp.lt.u32.totalorder %s1262_s29, %s1258_s19  ;;  %p1266_p12 = scmp.lt.u32.totalorder %s1258_s19, %s1737_s9 }
 0x1b2   : > { %p1260_p13 = pnand %p1259_p5, %p1847_p10 }
 0x1b3   : > { %p1265_p8 = por %p1264_p6, %p1263_p3 }
 0x1b4   : > { %p1261_p7 = pneg %p1260_p13 }
 0x1b5   : > { %p1267_p0 = por %p1266_p12, %p1265_p8 }
 0x1b7   : > { %p1268_p11 = pnand %p1267_p0, %p1261_p7 }
 0x1b9   : > { %1271 = shalt.err (!%p1268_p11)
}
 0x1ba   : > { %979 = dma.vmem_to_hbm [thread:$0]  (%p1847_p10), %s696_s15, 64, %s1737_s9, %s1709_s18  }
 0x1bb PF: > { %s1849_s22 = sld [smem:[#allocation19_spill]]  ;;  %s1850_s13 = sld [smem:[#allocation25_spill]] }
 0x1bc   : > { %s1851_s1 = sld [smem:[#allocation21_spill]] }
 0x1c1   : > { %s707_s30 = sand.u32 1, %s1849_s22   ;;  %p1852_p1 = scmp.ne.s32.totalorder %s1850_s13, 0 }
 0x1c2   : > { %p1853_p9 = scmp.ge.s32.totalorder %s1851_s1, 2  ;;  %s708_s6 = scalar_lea.sflag [#allocation4], %s707_s30 }
 0x1c4   : > { %p998_p4 = pnand %p1853_p9, %p1852_p1 }
 0x1c6   : > { %1309 = dma.done.wait (!%p998_p4), %s708_s6, 64  }
 0x1c7   : > { %1311 = vsyncadd (!%p998_p4), %s708_s6, 4294967232  ;;  %s1854_s23 = sadd.s32 4294967294, %s1851_s1  }
 0x1c8   : > { %s716_s8 = sand.u32 1, %s1854_s23  }
 0x1c9   : > { %s717_s27 = scalar_lea.sflag [#allocation12], %s716_s8 }
 0x1ca   : > { %1313 = dma.done.wait (!%p998_p4), %s717_s27, 128  }
 0x1cb   : > { %1315 = vsyncadd (!%p998_p4), %s717_s27, 4294967168  ;;  %s31_s29 = sadd.s32 1, %s1851_s1   ;;  %s1855_s10 = sld [smem:[#allocation23_spill]] }
 0x1cc   : > { %p28_p10 = scmp.ge.s32.totalorder %s31_s29, 4   ;;  %s1856_s27 = sld [smem:[#allocation20_spill]] }
 0x1cd   : > { %s1857_s28 = sld [smem:[#allocation22_spill]]  ;;  %s1858_s24 = smov %s1322_s25 }
 0x1ce   : > { %s1859_s25 = smov %s1326_s26  ;;  %30 = sbr.rel (!%p28_p10) target bundleno = 16 (0x10), region = 149 }
 0x1d1   : > { %s1860_s26 = smov %s1855_s10 }
 0x1d5   :  { %731 = vsyncpa [#allocation3], 1 }
 0x1d6   :  { %733 = vsyncpa [#allocation3 + $0x1], 1 }
 0x1d7   :  { %734 = vsyncpa [#allocation6], 1 }
 0x1d8   :  { %736 = vsyncpa [#allocation6 + $0x1], 1 }
 0x1d9   :  { %737 = vsyncpa [#allocation9], 1 }
 0x1da   :  { %738 = vsyncpa [#allocation4], 1 }
 0x1db   :  { %740 = vsyncpa [#allocation4 + $0x1], 1 }
 0x1dc   :  { %741 = vsyncpa [#allocation12], 1 }
 0x1dd   :  { %743 = vsyncpa [#allocation12 + $0x1], 1 }

</bundles_post_ra>
